<compile_context>
chip_gen: v5e
topology: v5e:2x2
jax: 0.10.0
libtpu: 0.0.40
codegen_flags: <defaults>
</compile_context>

<pallas_src>
import math

import jax
import jax.numpy as jnp
from jax import lax
from jax.experimental import pallas as pl
from jax.experimental.pallas import tpu as pltpu


def _patch_embed_matmul_kernel(x_ref, w_ref, b_ref, o_ref):
    # x_ref: (TM, Kg) folded patch rows; w_ref: (Kg, TN) block-diagonal
    # projection; b_ref: (1, TN) tiled bias (f32); o_ref: (TM, TN).
    acc = jnp.dot(
        x_ref[...],
        w_ref[...],
        preferred_element_type=jnp.float32,
        precision=lax.Precision.HIGHEST,
    )
    o_ref[...] = (acc + b_ref[...]).astype(o_ref.dtype)


def _choose_fold_group(patch_size, embed_dim, M, max_kg=1024):
    """Pick G patches-per-row so Kg=G*P and (ideally) Ng=G*E are 128-multiples."""
    g_k = 128 // math.gcd(patch_size, 128)   # smallest G making Kg % 128 == 0
    g_n = 128 // math.gcd(embed_dim, 128)    # smallest G making Ng % 128 == 0
    g_both = g_k * g_n // math.gcd(g_k, g_n)
    for g in (g_both, g_k, g_n, 1):
        if g * patch_size <= max_kg and M % g == 0:
            return g
    return 1


def conv_patch_embedding(
    x,
    conv_weight,
    conv_bias,
    *,
    patch_size,
    embed_dim,
    block_rows=4096,
    min_rows_for_pallas=4096,
):
    """JAX/Pallas equivalent of ConvPatchEmbedding.forward.

    Args:
        x: (B, L) activity sequence (f32 or bf16).
        conv_weight: (embed_dim, 1, patch_size) -- PyTorch Conv1d weight layout.
        conv_bias: (embed_dim,) -- PyTorch Conv1d bias.
        block_rows: row-tile upper bound for the folded GEMM (rounded to 8 and
            capped by a per-chip VMEM budget).
        min_rows_for_pallas: below this many patches, dispatch to plain jnp
            (kernel launch/pipeline overhead dominates at tiny sizes).

    Returns:
        (B, num_patches, embed_dim) patch embeddings, dtype of x.
    """
    B, L = x.shape
    # TODO(synk): PyTorch Conv1d silently drops trailing elements when
    # L % patch_size != 0; we require exact divisibility instead.
    assert L % patch_size == 0, "sequence length must be divisible by patch_size"
    num_patches = L // patch_size
    M = B * num_patches

    # (P, E) projection matrix shared by both paths.
    w2 = jnp.transpose(conv_weight.reshape(embed_dim, patch_size)).astype(x.dtype)
    bias_f32 = conv_bias.astype(jnp.float32)

    G = _choose_fold_group(patch_size, embed_dim, M)
    Mg = M // G

    # Tiny-shape gate: at small M the fused XLA matmul beats any kernel launch.
    if M < min_rows_for_pallas or Mg < 8:
        rows = x.reshape(M, patch_size).astype(jnp.float32)
        out = rows @ w2.astype(jnp.float32) + bias_f32[None, :]
        return out.astype(x.dtype).reshape(B, num_patches, embed_dim)

    return _conv_patch_embedding_pallas(
        x, w2, bias_f32,
        B=B, num_patches=num_patches, patch_size=patch_size,
        embed_dim=embed_dim, G=G, block_rows=block_rows,
    )


def _conv_patch_embedding_pallas(
    x, w2, bias_f32, *, B, num_patches, patch_size, embed_dim, G, block_rows
):
    M = B * num_patches
    Kg = G * patch_size      # contraction dim seen by the kernel
    Ng = G * embed_dim       # logical output dim per folded row
    Mg = M // G              # folded row count

    # ---- Block-diagonal weight / tiled bias for the folded GEMM. ----
    if G > 1:
        eye = jnp.eye(G, dtype=w2.dtype)
        # (G, P, H, E): block (g, h) is w2 iff g == h.
        w_g = jnp.einsum("pe,gh->gphe", w2, eye).reshape(Kg, Ng)
        b_g = jnp.tile(bias_f32, (G,)).reshape(1, Ng)
    else:
        w_g = w2
        b_g = bias_f32.reshape(1, Ng)

    # Column padding only needed when the fold could not make Ng a 128-multiple.
    Npad = max(128, ((Ng + 127) // 128) * 128)
    if Npad != Ng:
        w_g = jnp.pad(w_g, ((0, 0), (0, Npad - Ng)))
        b_g = jnp.pad(b_g, ((0, 0), (0, Npad - Ng)))

    # Output-column tile: largest 128-multiple (<=1024) dividing Npad.
    TN = 128
    for cand in (1024, 512, 256, 128):
        if Npad % cand == 0:
            TN = cand
            break
    grid_n = Npad // TN

    # Folded patch rows: pure row-major reinterpretation of the (B, L) buffer.
    x_g = x.reshape(Mg, Kg)

    # ---- VMEM-budget-aware row tile (amortize ~0.35 us per grid step). ----
    itemsize = jnp.dtype(x.dtype).itemsize
    try:
        info = pltpu.get_tpu_info()
        phys_vmem = int(getattr(info, "vmem_capacity_bytes", 64 << 20))
    except Exception:  # pragma: no cover - conservative fallback off-TPU
        phys_vmem = 64 << 20
    budget = min(phys_vmem // 2, 48 << 20)
    # Weight/bias tiles (default double-buffered) + double-buffered x/out tiles.
    fixed_bytes = 2 * (Kg * TN + TN) * max(itemsize, 4)
    per_row_bytes = 2 * (Kg + TN) * itemsize
    tm_budget = max(8, (budget - fixed_bytes) // per_row_bytes)

    block_rows = max(8, ((int(block_rows) + 7) // 8) * 8)  # force multiple of 8
    tm_rows = max(8, (Mg // 8) * 8)                         # never exceed the array
    TM = int(min(block_rows, tm_budget, tm_rows))
    TM = max(8, (TM // 8) * 8)

    grid_m = pl.cdiv(Mg, TM)   # trailing partial row block is masked by Pallas

    vmem_need = fixed_bytes + per_row_bytes * TM
    vmem_limit = int(min(phys_vmem, max(2 * vmem_need, 32 << 20)))

    cost = pl.CostEstimate(
        flops=2 * Mg * Kg * Npad,
        bytes_accessed=(Mg * Kg + Mg * Npad) * itemsize + (Kg * Npad + Npad) * 4,
        transcendentals=0,
    )

    out = pl.pallas_call(
        _patch_embed_matmul_kernel,
        out_shape=jax.ShapeDtypeStruct((Mg, Npad), x.dtype),
        grid=(grid_m, grid_n),
        in_specs=[
            # x rows stream along the M axis; block is reused across the N axis.
            pl.BlockSpec((TM, Kg), lambda i, j: (i, 0)),
            # Weight / bias: only depend on the N axis -> small resident tiles.
            pl.BlockSpec((Kg, TN), lambda i, j: (0, j)),
            pl.BlockSpec((1, TN), lambda i, j: (0, j)),
        ],
        out_specs=pl.BlockSpec((TM, TN), lambda i, j: (i, j)),
        compiler_params=pltpu.CompilerParams(
            dimension_semantics=("parallel", "parallel"),
            vmem_limit_bytes=vmem_limit,
        ),
        cost_estimate=cost,
    )(x_g, w_g, b_g)

    if Npad != Ng:
        out = out[:, :Ng]
    # Unfold groups: (Mg, G*E) row-major == (M, E) row-major.
    return out.reshape(B, num_patches, embed_dim)


if __name__ == "__main__":
    # Small shapes consistent with the module's forward:
    #   x: (batch, seq_len); patch_size=16 -> num_patches=64; embed_dim=32.
    batch = 2
    seq_len = 1024
    patch_size = 16
    embed_dim = 32

    key = jax.random.PRNGKey(0)
    kx, kw, kb = jax.random.split(key, 3)

    x = jax.random.normal(kx, (batch, seq_len), dtype=jnp.float32)
    # Same parameter shapes as nn.Conv1d(1, E, kernel_size=P, stride=P):
    # weight (E, 1, P), bias (E,).
    conv_weight = jax.random.normal(kw, (embed_dim, 1, patch_size), dtype=jnp.float32) * 0.1
    conv_bias = jax.random.normal(kb, (embed_dim,), dtype=jnp.float32) * 0.1

    # Force the Pallas path (min_rows_for_pallas=0) and a small row tile so the
    # demo exercises a multi-step grid even at these small shapes.
    out = conv_patch_embedding(
        x, conv_weight, conv_bias,
        patch_size=patch_size, embed_dim=embed_dim,
        block_rows=8, min_rows_for_pallas=0,
    )
    out = jax.block_until_ready(out)

    # Reference in plain JAX (same math as PyTorch Conv1d with stride == kernel).
    num_patches = seq_len // patch_size
    ref = (
        x.reshape(batch * num_patches, patch_size)
        @ conv_weight.reshape(embed_dim, patch_size).T
        + conv_bias[None, :]
    ).reshape(batch, num_patches, embed_dim)

    assert out.shape == (batch, num_patches, embed_dim), out.shape
    # Tolerance leaves margin for MXU f32 pass decomposition differences across
    # TPU generations; logic errors produce O(0.1-1) deviations and still fail.
    assert jnp.allclose(out, ref, atol=1e-2, rtol=1e-3), "mismatch vs reference"

    print("KERNEL_OK")
</pallas_src>

<mosaic_0001>
module attributes {stable_mosaic.version = 11 : i64} {
  func.func @_patch_embed_matmul_kernel(%arg0: i32, %arg1: i32, %arg2: memref<8x128xf32, #tpu.memory_space<vmem>>, %arg3: memref<128x256xf32, #tpu.memory_space<vmem>>, %arg4: memref<1x256xf32, #tpu.memory_space<vmem>>, %arg5: memref<8x256xf32, #tpu.memory_space<vmem>>) attributes {dimension_semantics = [#tpu.dimension_semantics<parallel>, #tpu.dimension_semantics<parallel>], iteration_bounds = array<i64: 2, 1>, scalar_prefetch = 0 : i64, scratch_operands = 0 : i64, tpu.core_type = #tpu.core_type<tc>, window_params = [{transform_indices = @transform_0, window_bounds = array<i64: 8, 128>}, {transform_indices = @transform_1, window_bounds = array<i64: 128, 256>}, {transform_indices = @transform_2, window_bounds = array<i64: 1, 256>}, {transform_indices = @transform_3, window_bounds = array<i64: 8, 256>}]} {
    %c0 = arith.constant 0 : index
    %c0_0 = arith.constant 0 : index
    %0 = vector.load %arg2[%c0, %c0_0] : memref<8x128xf32, #tpu.memory_space<vmem>>, vector<8x128xf32>
    %c0_1 = arith.constant 0 : index
    %c0_2 = arith.constant 0 : index
    %1 = vector.load %arg3[%c0_1, %c0_2] : memref<128x256xf32, #tpu.memory_space<vmem>>, vector<128x256xf32>
    %cst = arith.constant dense<0.000000e+00> : vector<8x256xf32>
    %2 = tpu.matmul %0, %1, %cst {dimension_numbers = #tpu.dot_dimension_numbers<[1], [0], [0], [1], [0, 0, 1, 1], [], []>, precision = #tpu.contract_precision<fp32>} : vector<8x128xf32>, vector<128x256xf32>, vector<8x256xf32> -> vector<8x256xf32>
    %c0_3 = arith.constant 0 : index
    %c0_4 = arith.constant 0 : index
    %3 = vector.load %arg4[%c0_3, %c0_4] : memref<1x256xf32, #tpu.memory_space<vmem>>, vector<1x256xf32>
    %4 = vector.broadcast %3 : vector<1x256xf32> to vector<8x256xf32>
    %5 = arith.addf %2, %4 : vector<8x256xf32>
    %c0_5 = arith.constant 0 : index
    %c0_6 = arith.constant 0 : index
    %6 = vector.load %arg5[%c0_5, %c0_6] : memref<8x256xf32, #tpu.memory_space<vmem>>, vector<8x256xf32>
    tpu.vector_store %arg5[%c0_5, %c0_6], %5 {strides = array<i32>} : memref<8x256xf32, #tpu.memory_space<vmem>>, vector<8x256xf32>,
    return
  }
  func.func @transform_0(%arg0: i32, %arg1: i32) -> (i32, i32) {
    %c0_i32 = arith.constant 0 : i32
    %c0_i32_0 = arith.constant 0 : i32
    return %arg0, %c0_i32 : i32, i32
  }
  func.func @transform_1(%arg0: i32, %arg1: i32) -> (i32, i32) {
    %c0_i32 = arith.constant 0 : i32
    %c0_i32_0 = arith.constant 0 : i32
    return %c0_i32, %arg1 : i32, i32
  }
  func.func @transform_2(%arg0: i32, %arg1: i32) -> (i32, i32) {
    %c0_i32 = arith.constant 0 : i32
    %c0_i32_0 = arith.constant 0 : i32
    return %c0_i32, %arg1 : i32, i32
  }
  func.func @transform_3(%arg0: i32, %arg1: i32) -> (i32, i32) {
    %c0_i32 = arith.constant 0 : i32
    return %arg0, %arg1 : i32, i32
  }
}

</mosaic_0001>

<bundles_post_ra>
// kernel: tpu_custom_call.1
= control target key start
LH: loop header
LB: loop body
LE: loop exit
PB: predicated region body
PF: predicated region fallthrough
CT: control target
= control target key end

     0   :  { %8 = vsyncpa [#allocation3], 0  ;;  %s2051_s0 = inlined_call_operand.hbm [shape: f32[16,128], index: 0, kind: input, shape index: {}]   ;;  %s2052_s1 = inlined_call_operand.hbm [shape: f32[128,256], index: 1, kind: input, shape index: {}]   ;;  %s2053_s2 = inlined_call_operand.hbm [shape: f32[1,256], index: 2, kind: input, shape index: {}]   ;;  %s2054_s3 = inlined_call_operand.hbm [shape: f32[16,256], index: 3, kind: output, shape index: {}]  }
   0x1   :  { %10 = vsyncpa [#allocation3 + $0x1], 0 }
   0x2   :  { %11 = vsyncpa [#allocation6], 0 }
   0x3   :  { %12 = vsyncpa [#allocation4], 0 }
   0x4   :  { %14 = vsyncpa [#allocation4 + $0x1], 0  ;;  %s1403_s12 = smov 0   ;;  %s1405_s13 = smov 0  }
   0x5   :  { %s1407_s14 = smov 0   ;;  %s1409_s15 = smov 0  }
   0x6   :  { %s1411_s16 = smov 0   ;;  %s1413_s17 = smov 0  }
   0x7 LB: > { %s1097_s18 = sadd.s32 4294967295, %s1377_s17   ;;  %p1099_p0 = scmp.ge.s32.totalorder %s1377_s17, 1  ;;  %s1377_s17 = sphi %s1413_s17, %s20_s17   ;;  %s1373_s16 = sphi %s1411_s16, %s2134_s16   ;;  %s1369_s15 = sphi %s1409_s15, %s2133_s15   ;;  %s1365_s14 = sphi %s1407_s14, %s2132_s14   ;;  %s1361_s13 = sphi %s1405_s13, %s2131_s13   ;;  %s1357_s12 = sphi %s1403_s12, %s2130_s12  }
   0x8   : > { %p1437_p1 = scmp.eq.s32.totalorder %s1097_s18, 0  ;;  %p143_p2 = scmp.lt.s32.totalorder %s1377_s17, 3 }
   0x9   : > { %s157_s22 = sshll.u32 %s2052_s1, 4  ;;  %s1379_s24 = smov [#allocation5]   ;;  %s158_s22 = int_to_ptr.hbm [resolvable:$true] %s157_s22 }
   0xa   : > { %p1445_p3 = pnand %p1099_p0, %p143_p2  ;;  %s159_s25 = sshll.u32 %s1379_s24, 4  ;;  %s160_s25 = int_to_ptr.vmem [resolvable:$true] %s159_s25 }
   0xb   : > { %p1102_p6 = scmp.ge.s32.totalorder %s1377_s17, 2  ;;  %s174_s28 = sshll.u32 %s2053_s2, 4  ;;  %s175_s28 = int_to_ptr.hbm [resolvable:$true] %s174_s28 }
   0xc   : > { %p1128_p4 = pneg %p1445_p3  ;;  %s1380_s29 = smov 256  }
   0xd   : > { %s1381_s30 = smov 16   ;;  %s1382_s4 = smov [#allocation7]  }
   0xe   : > { %p1129_p5 = pnand %p1128_p4, %p1437_p1  ;;  %s176_s5 = sshll.u32 %s1382_s4, 4  ;;  %s177_s5 = int_to_ptr.vmem [resolvable:$true] %s176_s5 }
   0xf   : > { %s32_s6 = sadd.s32 1, %s1373_s16  ;;  %s1098_s7 = sadd.s32 4294967294, %s1377_s17  }
  0x10   : > { %1131 = dma.hbm_to_vmem [thread:$0]  (!%p1129_p5), %s158_s22, 4096, %s160_s25, [#allocation6], %s1380_s29, %s1380_s29, %s1381_s30  }
  0x11   : > { %1134 = dma.hbm_to_vmem [thread:$0]  (!%p1129_p5), %s175_s28, 32, %s177_s5, [#allocation6]  }
  0x12   : > { %p34_p7 = scmp.ge.s32.totalorder %s32_s6, 2  ;;  %s39_s8 = sadd.s32 1, %s1365_s14 }
  0x13   : > { %p46_p8 = scmp.ne.s32.totalorder %s1365_s14, %s1361_s13  ;;  %p47_p9 = scmp.eq.s32.totalorder %s1377_s17, 0 }
  0x14   : > { %s2136_s6 = smov (%p34_p7, %s32_s6), 0  ;;  %p52_p10 = scmp.ne.s32.totalorder %s1361_s13, %s1357_s12 }
  0x15   : > { %s36_s9 = ssub.s32 %s1373_s16, %s2136_s6  ;;  %p130_p11 = scmp.eq.s32.totalorder %s1097_s18, 1 }
  0x16   : > { %p37_p12 = scmp.eq.s32.totalorder %s36_s9, 0  ;;  %p1473_p13 = por %p1437_p1, %p52_p10 }
  0x17   : > { %p1477_p0 = por %p130_p11, %p46_p8  ;;  %p136_p2 = scmp.eq.s32.totalorder %s1098_s7, 1 }
  0x18   : > { %s1482_s20 = scalar_select %p37_p12, %s1365_s14, %s39_s8  }
  0x19   : > { %p48_p4 = por %p47_p9, %p46_p8  ;;  %p1484_p5 = por %p136_p2, %p52_p10 }
  0x1a   : > { %s187_s22 = sand.u32 1, %s1365_s14   ;;  %s1104_s18 = sshll.u32 %s1373_s16, 3 }
  0x1b   : > { %p1145_p7 = scmp.lt.s32.totalorder %s1377_s17, 2  ;;  %s1103_s24 = sshll.u32 %s187_s22, 3 }
  0x1c   : > { %s195_s27 = scalar_lea.hbm %s2051_s0, %s1104_s18  ;;  %s191_s29 = scalar_lea.vmem [#allocation2], %s1103_s24 }
  0x1d   : > { %s197_s28 = sshll.u32 %s195_s27, 4  ;;  %s199_s30 = sshll.u32 %s191_s29, 4  ;;  %s198_s28 = int_to_ptr.hbm [resolvable:$true] %s197_s28  ;;  %s200_s30 = int_to_ptr.vmem [resolvable:$true] %s199_s30 }
  0x1e   : > { %p1136_p11 = pnand %p1145_p7, %p48_p4  ;;  %s188_s4 = scalar_lea.sflag [#allocation3], %s187_s22 }
  0x1f   : > { %208 = sbr.rel (%p1445_p3) target bundleno = 285 (0x11d), region = 32 }
  0x20   : > { %1138 = dma.hbm_to_vmem [thread:$0]  (!%p1136_p11), %s198_s28, 128, %s200_s30, %s188_s4  }
  0x24   : > { %s1497_s5 = sand.u32 1, %s1361_s13  }
  0x25   : > { %s1106_s7 = sshll.u32 %s1497_s5, 3  ;;  %s211_s8 = scalar_lea.sflag [#allocation3], %s1497_s5 }
  0x26   : > { %s1501_s9 = scalar_lea.vmem [#allocation2], %s1106_s7 }
  0x27   : > { %1344 = dma.done.wait (%p1473_p13), %s211_s8, 128  }
  0x28   : > { %1346 = vsyncadd (%p1473_p13), %s211_s8, 4294967168 }
  0x29   : > { %1348 = dma.done.wait (%p1437_p1), [#allocation6], 4128  }
  0x2a   : > { %1350 = vsyncadd (%p1437_p1), [#allocation6], 4294963168  ;;  %v282_v0 = vld [vmem:[#allocation5 + $0xf0] sm:$0xff]  ;;  %v280_v1 = vld [vmem:[#allocation5 + $0xe0] sm:$0xff]  ;;  %s1109_s19 = sshll.u32 %s1497_s5, 4  ;;  %s1115_s10 = sshll.u32 %s1369_s15, 4 }
  0x2b   : > { %v278_v2 = vld [vmem:[#allocation5 + $0xd0] sm:$0xff]  ;;  %v1511_v3 = vand.u32 4294901760, %v282_v0  ;;  %v1513_v4 = vand.u32 4294901760, %v280_v1  ;;  %v276_v6 = vld [vmem:[#allocation5 + $0xc0] sm:$0xff]  ;;  %v283_v60 = vld [vmem:[#allocation5 + $0xf8] sm:$0xff]  ;;  %s247_s23 = scalar_lea.vmem [#allocation8], %s1109_s19  ;;  %s988_s24 = scalar_lea.hbm %s2054_s3, %s1115_s10 }
  0x2c   : > { %v1515_v5 = vand.u32 4294901760, %v278_v2  ;;  %v274_v7 = vld [vmem:[#allocation5 + $0xb0] sm:$0xff]  ;;  %v272_v8 = vld [vmem:[#allocation5 + $0xa0] sm:$0xff]  ;;  %v1517_v9 = vand.u32 4294901760, %v276_v6  ;;  %v281_v63 = vld [vmem:[#allocation5 + $0xe8] sm:$0xff]  ;;  %s990_s25 = sshll.u32 %s247_s23, 4  ;;  %s991_s25 = int_to_ptr.vmem [resolvable:$true] %s990_s25 }
  0x2d   : > { %v1519_v10 = vand.u32 4294901760, %v274_v7  ;;  %v1521_v11 = vand.u32 4294901760, %v272_v8  ;;  %v270_v12 = vld [vmem:[#allocation5 + $0x90] sm:$0xff]  ;;  %v268_v13 = vld [vmem:[#allocation5 + $0x80] sm:$0xff]  ;;  %v1524_v14 = vsub.f32 %v282_v0, %v1511_v3  ;;  %291 = vmatpush.msra.mxu0 %v1511_v3  ;;  %v1528_v15 = vsub.f32 %v280_v1, %v1513_v4  ;;  %487 = vmatpush.msra.mxu3 %v1511_v3  ;;  %s992_s26 = sshll.u32 %s988_s24, 4  ;;  %s975_s27 = scalar_lea.sflag [#allocation4], %s1497_s5  ;;  %s993_s26 = int_to_ptr.hbm [resolvable:$true] %s992_s26 }
  0x2e   : > { %v1532_v16 = vsub.f32 %v278_v2, %v1515_v5  ;;  %v1534_v17 = vand.u32 4294901760, %v270_v12  ;;  %v1537_v18 = vsub.f32 %v276_v6, %v1517_v9  ;;  %v1550_v24 = vand.u32 4294901760, %v268_v13  ;;  %v266_v25 = vld [vmem:[#allocation5 + $0x70] sm:$0xff]  ;;  %v264_v34 = vld [vmem:[#allocation5 + $0x60] sm:$0xff]  ;;  %s1305_s15 = sshra.s32 %s993_s26, 4  ;;  %s1311_s4 = scalar_lea.hbm %s2054_s3, 32  ;;  %s1306_s15 = int_to_ptr.hbm [resolvable:$true] %s1305_s15 }
  0x2f   : > { %v1540_v19 = vsub.f32 %v274_v7, %v1519_v10  ;;  %v1543_v20 = vsub.f32 %v272_v8, %v1521_v11  ;;  %434 = vmatpush.msra.mxu2 %v1524_v14  ;;  %293 = vmatpush.msra.mxu0 %v1513_v4  ;;  %v2069_v21 = vand.u32 4294901760, %v1524_v14  ;;  %v2068_v22 = vand.u32 4294901760, %v1528_v15  ;;  %v262_v35 = vld [vmem:[#allocation5 + $0x50] sm:$0xff]  ;;  %v260_v40 = vld [vmem:[#allocation5 + $0x40] sm:$0xff]  ;;  %s1307_s28 = scalar_lea.hbm %s1306_s15, 16  ;;  %p1312_p9 = scmp.lt.s32.totalorder %s1306_s15, %s2054_s3 }
  0x30   : > { %v2067_v23 = vand.u32 4294901760, %v1532_v16  ;;  %489 = vmatpush.msra.mxu3 %v1513_v4  ;;  %v2064_v26 = vand.u32 4294901760, %v1537_v18  ;;  %v1555_v27 = vsub.f32 %v270_v12, %v1534_v17  ;;  %v1571_v33 = vand.u32 4294901760, %v266_v25  ;;  %v258_v48 = vld [vmem:[#allocation5 + $0x30] sm:$0xff]  ;;  %v256_v53 = vld [vmem:[#allocation5 + $0x20] sm:$0xff]  ;;  %p1308_p1 = scmp.ne.s32.totalorder %s1306_s15, %s1307_s28  ;;  %p1313_p10 = scmp.lt.s32.totalorder %s1311_s4, %s1307_s28 }
  0x31   : > { %437 = vmatpush.msra.mxu2 %v1528_v15  ;;  %v334_v28 = vsub.f32 %v1524_v14, %v2069_v21  ;;  %295 = vmatpush.msra.mxu0 %v1515_v5  ;;  %v340_v29 = vsub.f32 %v1528_v15, %v2068_v22  ;;  %v2063_v31 = vand.u32 4294901760, %v1540_v19  ;;  %v2061_v32 = vand.u32 4294901760, %v1543_v20  ;;  %v254_v59 = vld [vmem:[#allocation5 + $0x10] sm:$0xff]  ;;  %v252_v6 = vld [vmem:[#allocation5] sm:$0xff] }
  0x32   : > { %v346_v30 = vsub.f32 %v1532_v16, %v2067_v23  ;;  %491 = vmatpush.msra.mxu3 %v1515_v5  ;;  %v352_v38 = vsub.f32 %v1537_v18, %v2064_v26  ;;  %v1579_v39 = vsub.f32 %v268_v13, %v1550_v24  ;;  %v2060_v41 = vand.u32 4294901760, %v1555_v27  ;;  %v279_v13 = vld [vmem:[#allocation5 + $0xd8] sm:$0xff]  ;;  %p1309_p3 = pnand %p1308_p1, %p1477_p0  ;;  %p1314_p12 = por %p1313_p10, %p1312_p9 }
  0x33   : > { %v335_v36 = vand.u32 4294901760, %v334_v28  ;;  %440 = vmatpush.msra.mxu2 %v1532_v16  ;;  %v341_v37 = vand.u32 4294901760, %v340_v29  ;;  %297 = vmatpush.msra.mxu0 %v1517_v9  ;;  %v1584_v42 = vsub.f32 %v266_v25, %v1571_v33  ;;  %v358_v44 = vsub.f32 %v1540_v19, %v2063_v31  ;;  %v267_v26 = vld [vmem:[#allocation5 + $0x78] sm:$0xff] }
  0x34   : > { %493 = vmatpush.msra.mxu3 %v1517_v9  ;;  %v347_v43 = vand.u32 4294901760, %v346_v30  ;;  %v1590_v45 = vand.u32 4294901760, %v264_v34  ;;  %v1592_v46 = vand.u32 4294901760, %v262_v35  ;;  %v1596_v47 = vand.u32 4294901760, %v260_v40  ;;  %p1310_p8 = pneg %p1309_p3 }
  0x35   : > { %336 = vmatpush.msra.mxu1 %v335_v36  ;;  %443 = vmatpush.msra.mxu2 %v1537_v18  ;;  %v353_v49 = vand.u32 4294901760, %v352_v38  ;;  %v364_v50 = vsub.f32 %v1543_v20, %v2061_v32  ;;  %v2059_v51 = vand.u32 4294901760, %v1579_v39  ;;  %v2058_v54 = vand.u32 4294901760, %v1584_v42  ;;  %v269_v32 = vld [vmem:[#allocation5 + $0x88] sm:$0xff] }
  0x36   : > { %299 = vmatpush.msra.mxu0 %v1519_v10  ;;  %495 = vmatpush.msra.mxu3 %v1519_v10  ;;  %v1604_v52 = vsub.f32 %v264_v34, %v1590_v45  ;;  %v359_v55 = vand.u32 4294901760, %v358_v44  ;;  %v370_v56 = vsub.f32 %v1555_v27, %v2060_v41  ;;  %v1614_v57 = vsub.f32 %v262_v35, %v1592_v46  ;;  %p1315_p13 = pnand %p1314_p12, %p1310_p8 }
  0x37   : > { %342 = vmatpush.msra.mxu1 %v341_v37  ;;  %446 = vmatpush.msra.mxu2 %v1540_v19  ;;  %v1616_v58 = vand.u32 4294901760, %v258_v48  ;;  %v1621_v61 = vsub.f32 %v260_v40, %v1596_v47  ;;  %v1623_v62 = vand.u32 4294901760, %v256_v53  ;;  %v365_v0 = vand.u32 4294901760, %v364_v50  ;;  %v277_v37 = vld [vmem:[#allocation5 + $0xc8] sm:$0xff]  ;;  %v275_v50 = vld [vmem:[#allocation5 + $0xb8] sm:$0xff] }
  0x38   : > { %301 = vmatpush.msra.mxu0 %v1521_v11  ;;  %497 = vmatpush.msra.mxu3 %v1521_v11  ;;  %v376_v1 = vsub.f32 %v1579_v39, %v2059_v51  ;;  %v2056_v2 = vand.u32 4294901760, %v1604_v52  ;;  %v382_v7 = vsub.f32 %v1584_v42, %v2058_v54  ;;  %v1635_v8 = vand.u32 4294901760, %v254_v59 }
  0x39   : > { %348 = vmatpush.msra.mxu1 %v347_v43  ;;  %449 = vmatpush.msra.mxu2 %v1543_v20  ;;  %v1637_v12 = vand.u32 4294901760, %v283_v60  ;;  %v371_v25 = vand.u32 4294901760, %v370_v56  ;;  %v2055_v28 = vand.u32 4294901760, %v1614_v57  ;;  %v1642_v29 = vsub.f32 %v258_v48, %v1616_v58 }
  0x3a   : > { %303 = vmatpush.msra.mxu0 %v1534_v17  ;;  %499 = vmatpush.msra.mxu3 %v1534_v17  ;;  %2091 = vst [vmem:[#allocation12_spill] sm:$0xff] %v1635_v8  ;;  %v1644_v30 = vand.u32 4294901760, %v281_v63  ;;  %v2057_v34 = vand.u32 4294901760, %v1621_v61  ;;  %v1650_v35 = vsub.f32 %v256_v53, %v1623_v62  ;;  %v1652_v36 = vand.u32 4294901760, %v252_v6 }
  0x3b   : > { %354 = vmatpush.msra.mxu1 %v353_v49  ;;  %452 = vmatpush.msra.mxu2 %v1555_v27  ;;  %2092 = vst [vmem:[#allocation13_spill] sm:$0xff] %v1637_v12  ;;  %v377_v38 = vand.u32 4294901760, %v376_v1  ;;  %v388_v40 = vsub.f32 %v1604_v52, %v2056_v2  ;;  %v1659_v43 = vsub.f32 %v283_v60, %v1637_v12  ;;  %v1661_v44 = vand.u32 4294901760, %v279_v13 }
  0x3c   : > { %305 = vmatpush.msra.mxu0 %v1550_v24  ;;  %501 = vmatpush.msra.mxu3 %v1550_v24  ;;  %2093 = vst [vmem:[#allocation14_spill] sm:$0xff] %v1652_v36  ;;  %v383_v48 = vand.u32 4294901760, %v382_v7  ;;  %v1666_v49 = vsub.f32 %v254_v59, %v1635_v8  ;;  %v394_v53 = vsub.f32 %v1614_v57, %v2055_v28  ;;  %v1676_v60 = vand.u32 4294901760, %v277_v37 }
  0x3d   : > { %360 = vmatpush.msra.mxu1 %v359_v55  ;;  %455 = vmatpush.msra.mxu2 %v1579_v39  ;;  %v2062_v55 = vand.u32 4294901760, %v1642_v29  ;;  %v1674_v56 = vsub.f32 %v281_v63, %v1644_v30  ;;  %v400_v59 = vsub.f32 %v1621_v61, %v2057_v34  ;;  %v2065_v1 = vand.u32 4294901760, %v1650_v35 }
  0x3e   : > { %307 = vmatpush.msra.mxu0 %v1571_v33  ;;  %503 = vmatpush.msra.mxu3 %v1571_v33  ;;  %v1685_v7 = vsub.f32 %v252_v6, %v1652_v36  ;;  %v389_v63 = vand.u32 4294901760, %v388_v40  ;;  %v1690_v28 = vsub.f32 %v279_v13, %v1661_v44  ;;  %v1692_v2 = vand.u32 4294901760, %v275_v50  ;;  %v271_v6 = vld [vmem:[#allocation5 + $0x98] sm:$0xff] }
  0x3f   : > { %366 = vmatpush.msra.mxu1 %v365_v0  ;;  %458 = vmatpush.msra.mxu2 %v1584_v42  ;;  %2094 = vst [vmem:[#allocation15_spill] sm:$0xff] %v1674_v56  ;;  %v273_v0 = vld [vmem:[#allocation5 + $0xa8] sm:$0xff]  ;;  %v2071_v34 = vand.u32 4294901760, %v1666_v49  ;;  %v406_v13 = vsub.f32 %v1642_v29, %v2062_v55  ;;  %v2070_v40 = vand.u32 4294901760, %v1674_v56  ;;  %v1705_v51 = vsub.f32 %v277_v37, %v1676_v60 }
  0x40   : > { %309 = vmatpush.msra.mxu0 %v1590_v45  ;;  %505 = vmatpush.msra.mxu3 %v1590_v45  ;;  %2095 = vst [vmem:[#allocation16_spill] sm:$0xff] %v1690_v28  ;;  %v1697_v54 = vand.u32 4294901760, %v273_v0  ;;  %v401_v41 = vand.u32 4294901760, %v400_v59  ;;  %v2076_v55 = vand.u32 4294901760, %v1690_v28  ;;  %v1719_v59 = vsub.f32 %v275_v50, %v1692_v2 }
  0x41   : > { %372 = vmatpush.msra.mxu1 %v371_v25  ;;  %461 = vmatpush.msra.mxu2 %v1604_v52  ;;  %v2066_v25 = vand.u32 4294901760, %v1659_v43  ;;  %2096 = vst [vmem:[#allocation17_spill] sm:$0xff] %v1705_v51  ;;  %v1721_v31 = vand.u32 4294901760, %v271_v6  ;;  %v681_v50 = vsub.f32 %v1674_v56, %v2070_v40  ;;  %v1736_v22 = vand.u32 4294901760, %v269_v32 }
  0x42   : > { %311 = vmatpush.msra.mxu0 %v1592_v46  ;;  %507 = vmatpush.msra.mxu3 %v1592_v46 }
  0x43   : > { %378 = vmatpush.msra.mxu1 %v377_v38  ;;  %464 = vmatpush.msra.mxu2 %v1614_v57  ;;  %v395_v38 = vand.u32 4294901760, %v394_v53  ;;  %v2074_v53 = vand.u32 4294901760, %v1685_v7  ;;  %v675_v37 = vsub.f32 %v1659_v43, %v2066_v25  ;;  %v407_v25 = vand.u32 4294901760, %v406_v13  ;;  %v265_v13 = vld [vmem:[#allocation5 + $0x68] sm:$0xff] }
  0x44   : > { %313 = vmatpush.msra.mxu0 %v1596_v47  ;;  %509 = vmatpush.msra.mxu3 %v1596_v47  ;;  %v1761_v23 = vsub.f32 %v269_v32, %v1736_v22 }
  0x45   : > { %384 = vmatpush.msra.mxu1 %v383_v48  ;;  %467 = vmatpush.msra.mxu2 %v1621_v61  ;;  %v412_v48 = vsub.f32 %v1650_v35, %v2065_v1  ;;  %v1729_v1 = vsub.f32 %v273_v0, %v1697_v54  ;;  %v424_v0 = vsub.f32 %v1685_v7, %v2074_v53  ;;  %v676_v40 = vand.u32 4294901760, %v675_v37 }
  0x46   : > { %315 = vmatpush.msra.mxu0 %v1616_v58  ;;  %511 = vmatpush.msra.mxu3 %v1616_v58  ;;  %v682_v37 = vand.u32 4294901760, %v681_v50 }
  0x47   : > { %390 = vmatpush.msra.mxu1 %v389_v63  ;;  %470 = vmatpush.msra.mxu2 %v1642_v29  ;;  %v418_v63 = vsub.f32 %v1666_v49, %v2071_v34  ;;  %v413_v21 = vand.u32 4294901760, %v412_v48  ;;  %v687_v34 = vsub.f32 %v1690_v28, %v2076_v55  ;;  %v1751_v48 = vsub.f32 %v271_v6, %v1721_v31  ;;  %v261_v28 = vld [vmem:[#allocation5 + $0x48] sm:$0xff] }
  0x48   : > { %317 = vmatpush.msra.mxu0 %v1623_v62  ;;  %513 = vmatpush.msra.mxu3 %v1623_v62  ;;  %v1763_v6 = vand.u32 4294901760, %v265_v13  ;;  %v425_v53 = vand.u32 4294901760, %v424_v0 }
  0x49   : > { %396 = vmatpush.msra.mxu1 %v395_v38  ;;  %473 = vmatpush.msra.mxu2 %v1650_v35  ;;  %v1743_v38 = vand.u32 4294901760, %v267_v26  ;;  %v419_v56 = vand.u32 4294901760, %v418_v63  ;;  %v2098_v63 = vand.u32 4294901760, %v1524_v14  ;;  %v688_v50 = vand.u32 4294901760, %v687_v34 }
  0x4a   : > { %319 = vmatpush.msra.mxu0 %v1635_v8  ;;  %515 = vmatpush.msra.mxu3 %v1635_v8  ;;  %v2097_v8 = vand.u32 4294901760, %v1705_v51  ;;  %v2100_v14 = vand.u32 4294901760, %v1528_v15  ;;  %v1785_v0 = vsub.f32 %v265_v13, %v1763_v6 }
  0x4b   : > { %402 = vmatpush.msra.mxu1 %v401_v41  ;;  %476 = vmatpush.msra.mxu2 %v1666_v49  ;;  %v263_v41 = vld [vmem:[#allocation5 + $0x58] sm:$0xff] }
  0x4c   : > { %321 = vmatpush.msra.mxu0 %v1652_v36  ;;  %517 = vmatpush.msra.mxu3 %v1652_v36  ;;  %v693_v55 = vsub.f32 %v1705_v51, %v2097_v8  ;;  %v2099_v8 = vand.u32 4294901760, %v1719_v59  ;;  %v710_v51 = vand.u32 4294901760, %v1751_v48  ;;  %v1775_v36 = vand.u32 4294901760, %v263_v41 }
  0x4d   : > { %408 = vmatpush.msra.mxu1 %v407_v25  ;;  %479 = vmatpush.msra.mxu2 %v1685_v7  ;;  %v1769_v25 = vsub.f32 %v267_v26, %v1743_v38  ;;  %v2101_v26 = vand.u32 4294901760, %v1729_v1 }
  0x4e   : > { %528 = vmatpush.msrb.mxu0 %v2098_v63  ;;  %677 = vmatpush.msrb.mxu3 %v676_v40  ;;  %v699_v32 = vsub.f32 %v1719_v59, %v2099_v8  ;;  %v694_v34 = vand.u32 4294901760, %v693_v55  ;;  %v2084_v40 = vand.u32 4294901760, %v1761_v23  ;;  %v1787_v63 = vand.u32 4294901760, %v261_v28 }
  0x4f   : > { %632 = vmatpush.msrb.mxu2 %v1637_v12  ;;  %414 = vmatpush.msra.mxu1 %v413_v21  ;;  %v259_v12 = vld [vmem:[#allocation5 + $0x38] sm:$0xff]  ;;  %v705_v21 = vsub.f32 %v1729_v1, %v2101_v26  ;;  %v2102_v8 = vand.u32 4294901760, %v1532_v16  ;;  %v2085_v15 = vand.u32 4294901760, %v1769_v25  ;;  %v257_v26 = vld [vmem:[#allocation5 + $0x28] sm:$0xff]  ;;  %v1799_v13 = vsub.f32 %v263_v41, %v1775_v36 }
  0x50   : > { %532 = vmatpush.msrb.mxu0 %v2100_v14  ;;  %683 = vmatpush.msrb.mxu3 %v682_v37  ;;  %v1793_v14 = vand.u32 4294901760, %v259_v12  ;;  %v700_v55 = vand.u32 4294901760, %v699_v32  ;;  %v255_v37 = vld [vmem:[#allocation5 + $0x18] sm:$0xff]  ;;  %v1810_v41 = vsub.f32 %v261_v28, %v1787_v63  ;;  %v1812_v32 = vand.u32 4294901760, %v257_v26 }
  0x51   : > { %634 = vmatpush.msrb.mxu2 %v1644_v30  ;;  %420 = vmatpush.msra.mxu1 %v419_v56  ;;  %v711_v56 = vsub.f32 %v1751_v48, %v710_v51  ;;  %v706_v16 = vand.u32 4294901760, %v705_v21  ;;  %v2104_v21 = vand.u32 4294901760, %v1540_v19  ;;  %v734_v28 = vand.u32 4294901760, %v1799_v13 }
  0x52   : > { %536 = vmatpush.msrb.mxu0 %v2102_v8  ;;  %689 = vmatpush.msrb.mxu3 %v688_v50  ;;  %v2103_v8 = vand.u32 4294901760, %v1537_v18  ;;  %v728_v50 = vand.u32 4294901760, %v1785_v0  ;;  %v1820_v18 = vsub.f32 %v259_v12, %v1793_v14 }
  0x53   : > { %636 = vmatpush.msrb.mxu2 %v1661_v44  ;;  %426 = vmatpush.msra.mxu1 %v425_v53  ;;  %v717_v53 = vsub.f32 %v1761_v23, %v2084_v40  ;;  %v251_v40 = vld [vmem:[%s1501_s9] sm:$0xff] }
  0x54   : > { %540 = vmatpush.msrb.mxu0 %v2103_v8  ;;  %695 = vmatpush.msrb.mxu3 %v694_v34  ;;  %v712_v34 = vand.u32 4294901760, %v711_v56  ;;  %v1825_v8 = vand.u32 4294901760, %v255_v37  ;;  %v729_v19 = vsub.f32 %v1785_v0, %v728_v50  ;;  %v1837_v56 = vsub.f32 %v257_v26, %v1812_v32 }
  0x55   : > { %595 = vmatpush.msrb.mxu1 %v1511_v3  ;;  %638 = vmatpush.msrb.mxu2 %v1676_v60  ;;  %v723_v3 = vsub.f32 %v1769_v25, %v2085_v15  ;;  %v2105_v15 = vand.u32 4294901760, %v1543_v20  ;;  %v718_v12 = vand.u32 4294901760, %v717_v53  ;;  %v2106_v20 = vand.u32 4294901760, %v1555_v27 }
  0x56   : > { %544 = vmatpush.msrb.mxu0 %v2104_v21  ;;  %701 = vmatpush.msrb.mxu3 %v700_v55  ;;  %v740_v55 = vand.u32 4294901760, %v1810_v41  ;;  %v746_v21 = vand.u32 4294901760, %v1820_v18  ;;  %v1850_v26 = vsub.f32 %v255_v37, %v1825_v8  ;;  %v1852_v53 = vand.u32 4294901760, %v251_v40 }
  0x57   : > { %597 = vmatpush.msrb.mxu1 %v1513_v4  ;;  %640 = vmatpush.msrb.mxu2 %v1692_v2  ;;  %v253_v4 = vld [vmem:[#allocation5 + $0x8] sm:$0xff]  ;;  %v730_v27 = vand.u32 4294901760, %v729_v19  ;;  %v2108_v37 = vand.u32 4294901760, %v1584_v42 }
  0x58   : > { %548 = vmatpush.msrb.mxu0 %v2105_v15  ;;  %707 = vmatpush.msrb.mxu3 %v706_v16  ;;  %v735_v15 = vsub.f32 %v1799_v13, %v734_v28  ;;  %v1847_v16 = vand.u32 4294901760, %v253_v4  ;;  %v1871_v19 = vsub.f32 %v251_v40, %v1852_v53  ;;  %v2110_v40 = vand.u32 4294901760, %v1614_v57 }
  0x59   : > { %599 = vmatpush.msrb.mxu1 %v1515_v5  ;;  %642 = vmatpush.msrb.mxu2 %v1697_v54  ;;  %v724_v5 = vand.u32 4294901760, %v723_v3  ;;  %v741_v3 = vsub.f32 %v1810_v41, %v740_v55 }
  0x5a   : > { %552 = vmatpush.msrb.mxu0 %v2106_v20  ;;  %713 = vmatpush.msrb.mxu3 %v712_v34  ;;  %v752_v34 = vand.u32 4294901760, %v1837_v56  ;;  %v1874_v20 = vsub.f32 %v253_v4, %v1847_v16 }
  0x5b   : > { %601 = vmatpush.msrb.mxu1 %v1517_v9  ;;  %644 = vmatpush.msrb.mxu2 %v1721_v31  ;;  %v2107_v9 = vand.u32 4294901760, %v1579_v39  ;;  %v736_v39 = vand.u32 4294901760, %v735_v15  ;;  %v742_v42 = vand.u32 4294901760, %v741_v3  ;;  %v1892_v15 = vand.u32 4294901760, %v1871_v19 }
  0x5c   : > { %719 = vmatpush.msrb.mxu3 %v718_v12  ;;  %v758_v12 = vand.u32 4294901760, %v1850_v26  ;;  %v764_v4 = vand.u32 4294901760, %v1874_v20  ;;  %482 = vmatmul.f32.vlgmr.msra.gmra.mxu2 %v1871_v19 }
  0x5d   : > { %603 = vmatpush.msrb.mxu1 %v1519_v10  ;;  %646 = vmatpush.msrb.mxu2 %v1736_v22  ;;  %v747_v10 = vsub.f32 %v1820_v18, %v746_v21  ;;  %v325_v3 = vsub.f32 %v1871_v19, %v1892_v15 }
  0x5e   : > { %556 = vmatpush.msrb.mxu0 %v2107_v9  ;;  %725 = vmatpush.msrb.mxu3 %v724_v5  ;;  %v753_v5 = vsub.f32 %v1837_v56, %v752_v34  ;;  %v2112_v9 = vand.u32 4294901760, %v1642_v29 }
  0x5f   : > { %605 = vmatpush.msrb.mxu1 %v1521_v11  ;;  %648 = vmatpush.msrb.mxu2 %v1743_v38  ;;  %v2109_v11 = vand.u32 4294901760, %v1604_v52  ;;  %v759_v52 = vsub.f32 %v1850_v26, %v758_v12 }
  0x60   : > { %560 = vmatpush.msrb.mxu0 %v2108_v37  ;;  %731 = vmatpush.msrb.mxu3 %v730_v27  ;;  %v754_v57 = vand.u32 4294901760, %v753_v5  ;;  %v2120_v37 = vld [vmem:[#allocation13_spill] sm:$0xff] }
  0x61   : > { %607 = vmatpush.msrb.mxu1 %v1534_v17  ;;  %650 = vmatpush.msrb.mxu2 %v1763_v6  ;;  %v748_v17 = vand.u32 4294901760, %v747_v10  ;;  %v760_v27 = vand.u32 4294901760, %v759_v52  ;;  %v326_v10 = vand.u32 4294901760, %v325_v3 }
  0x62   : > { %564 = vmatpush.msrb.mxu0 %v2109_v11  ;;  %737 = vmatpush.msrb.mxu3 %v736_v39 }
  0x63   : > { %609 = vmatpush.msrb.mxu1 %v1550_v24  ;;  %652 = vmatpush.msrb.mxu2 %v1775_v36  ;;  %v2111_v24 = vand.u32 4294901760, %v1621_v61  ;;  %v2114_v61 = vand.u32 4294901760, %v1666_v49 }
  0x64   : > { %568 = vmatpush.msrb.mxu0 %v2110_v40  ;;  %743 = vmatpush.msrb.mxu3 %v742_v42  ;;  %v2126_v42 = vand.u32 4294901760, %v1719_v59 }
  0x65   : > { %611 = vmatpush.msrb.mxu1 %v1571_v33  ;;  %654 = vmatpush.msrb.mxu2 %v1787_v63  ;;  %v765_v33 = vsub.f32 %v1874_v20, %v764_v4 }
  0x66   : > { %572 = vmatpush.msrb.mxu0 %v2111_v24  ;;  %749 = vmatpush.msrb.mxu3 %v748_v17 }
  0x67   : > { %613 = vmatpush.msrb.mxu1 %v1590_v45  ;;  %656 = vmatpush.msrb.mxu2 %v1793_v14  ;;  %v2113_v45 = vand.u32 4294901760, %v1650_v35  ;;  %v766_v29 = vand.u32 4294901760, %v765_v33  ;;  %v2117_v35 = vld [vmem:[#allocation12_spill] sm:$0xff] }
  0x68   : > { %576 = vmatpush.msrb.mxu0 %v2112_v9  ;;  %755 = vmatpush.msrb.mxu3 %v754_v57 }
  0x69   : > { %615 = vmatpush.msrb.mxu1 %v1592_v46  ;;  %658 = vmatpush.msrb.mxu2 %v1812_v32  ;;  %v2115_v46 = vand.u32 4294901760, %v1685_v7  ;;  %v2121_v7 = vld [vmem:[#allocation14_spill] sm:$0xff] }
  0x6a   : > { %580 = vmatpush.msrb.mxu0 %v2113_v45  ;;  %761 = vmatpush.msrb.mxu3 %v760_v27 }
  0x6b   : > { %617 = vmatpush.msrb.mxu1 %v1596_v47  ;;  %660 = vmatpush.msrb.mxu2 %v1825_v8  ;;  %v2116_v47 = vand.u32 4294901760, %v1659_v43 }
  0x6c   : > { %584 = vmatpush.msrb.mxu0 %v2114_v61  ;;  %767 = vmatpush.msrb.mxu3 %v766_v29 }
  0x6d   : > { %619 = vmatpush.msrb.mxu1 %v1616_v58  ;;  %662 = vmatpush.msrb.mxu2 %v1847_v16  ;;  %v2118_v58 = vld [vmem:[#allocation15_spill] sm:$0xff] }
  0x6e   : > { %588 = vmatpush.msrb.mxu0 %v2115_v46  ;;  %521 = vmatmul.f32.vlgmr.msra.gmra.mxu3 %v1892_v15  ;;  %v2119_v49 = vand.u32 4294901760, %v2118_v58 }
  0x6f   : > { %621 = vmatpush.msrb.mxu1 %v1623_v62  ;;  %869 = vmatpush.msra.mxu2 %v2116_v47  ;;  %v2122_v62 = vld [vmem:[#allocation16_spill] sm:$0xff] }
  0x70   : > { %327 = vmatmul.f32.vlgmr.msra.gmra.mxu0 %v326_v10  ;;  %936 = vmatpush.msra.mxu3 %v2120_v37  ;;  %v2123_v39 = vand.u32 4294901760, %v2122_v62 }
  0x71   : > { %623 = vmatpush.msrb.mxu1 %v2117_v35  ;;  %775 = vmatpush.msra.mxu0 %v1659_v43  ;;  %v2124_v43 = vld [vmem:[#allocation17_spill] sm:$0xff] }
  0x72   : > { %873 = vmatpush.msra.mxu2 %v2119_v49  ;;  %428 = vmatmul.f32.vlgmr.msra.gmra.mxu1 %v1852_v53  ;;  %v2125_v11 = vand.u32 4294901760, %v2124_v43 }
  0x73   : > { %625 = vmatpush.msrb.mxu1 %v2121_v7  ;;  %778 = vmatpush.msra.mxu0 %v2118_v58 }
  0x74   : > { %877 = vmatpush.msra.mxu2 %v2123_v39  ;;  %938 = vmatpush.msra.mxu3 %v1644_v30 }
  0x75   : > { %828 = vmatpush.msra.mxu1 %v2120_v37  ;;  %781 = vmatpush.msra.mxu0 %v2122_v62 }
  0x76   : > { %881 = vmatpush.msra.mxu2 %v2125_v11  ;;  %940 = vmatpush.msra.mxu3 %v1661_v44 }
  0x77   : > { %830 = vmatpush.msra.mxu1 %v1644_v30  ;;  %784 = vmatpush.msra.mxu0 %v2124_v43  ;;  %v2127_v30 = vand.u32 4294901760, %v1729_v1 }
  0x78   : > { %885 = vmatpush.msra.mxu2 %v2126_v42  ;;  %942 = vmatpush.msra.mxu3 %v1676_v60 }
  0x79   : > { %832 = vmatpush.msra.mxu1 %v1661_v44  ;;  %590 = vmatmul.f32.vlgmr.msrb.gmra.mxu0 %v1852_v53  ;;  %v2128_v44 = vand.u32 4294901760, %v1761_v23 }
  0x7a   : > { %787 = vmatpush.msra.mxu0 %v1719_v59  ;;  %889 = vmatpush.msra.mxu2 %v2127_v30 }
  0x7b   : > { %834 = vmatpush.msra.mxu1 %v1676_v60  ;;  %944 = vmatpush.msra.mxu3 %v1692_v2 }
  0x7c   : > { %627 = vmatmul.f32.vlgmr.msrb.gmra.mxu1 %v1852_v53  ;;  %790 = vmatpush.msra.mxu0 %v1729_v1 }
  0x7d   : > { %836 = vmatpush.msra.mxu1 %v1692_v2  ;;  %893 = vmatpush.msra.mxu2 %v710_v51  ;;  %v2129_v2 = vand.u32 4294901760, %v1769_v25 }
  0x7e   : > { %946 = vmatpush.msra.mxu3 %v1697_v54  ;;  %793 = vmatpush.msra.mxu0 %v1751_v48 }
  0x7f   : > { %838 = vmatpush.msra.mxu1 %v1697_v54  ;;  %897 = vmatpush.msra.mxu2 %v2128_v44 }
  0x80   : > { %948 = vmatpush.msra.mxu3 %v1721_v31  ;;  %796 = vmatpush.msra.mxu0 %v1761_v23 }
  0x81   : > { %840 = vmatpush.msra.mxu1 %v1721_v31  ;;  %901 = vmatpush.msra.mxu2 %v2129_v2 }
  0x82   : > { %950 = vmatpush.msra.mxu3 %v1736_v22  ;;  %799 = vmatpush.msra.mxu0 %v1769_v25 }
  0x83   : > { %842 = vmatpush.msra.mxu1 %v1736_v22  ;;  %905 = vmatpush.msra.mxu2 %v728_v50  ;;  %v284_v22 = vld [vmem:[#allocation7] sm:$0x3] }
  0x84   : > { %952 = vmatpush.msra.mxu3 %v1743_v38  ;;  %802 = vmatpush.msra.mxu0 %v1785_v0  ;;  %v286_v23 = vperm.slane %v284_v22, 0 }
  0x85   : > { %844 = vmatpush.msra.mxu1 %v1743_v38  ;;  %909 = vmatpush.msra.mxu2 %v734_v28 }
  0x86   : > { %954 = vmatpush.msra.mxu3 %v1763_v6  ;;  %805 = vmatpush.msra.mxu0 %v1799_v13 }
  0x87   : > { %846 = vmatpush.msra.mxu1 %v1763_v6  ;;  %913 = vmatpush.msra.mxu2 %v740_v55 }
  0x88   : > { %956 = vmatpush.msra.mxu3 %v1775_v36  ;;  %668 = vmatmul.f32.vlgmr.msrb.gmra.mxu2 %v326_v10 }
  0x89   : > { %808 = vmatpush.msra.mxu0 %v1810_v41  ;;  %848 = vmatpush.msra.mxu1 %v1775_v36 }
  0x8a   : > { %917 = vmatpush.msra.mxu2 %v746_v21  ;;  %958 = vmatpush.msra.mxu3 %v1787_v63 }
  0x8b   : > { %769 = vmatmul.f32.vlgmr.msrb.gmra.mxu3 %v1852_v53  ;;  %811 = vmatpush.msra.mxu0 %v1820_v18 }
  0x8c   : > { %850 = vmatpush.msra.mxu1 %v1787_v63  ;;  %921 = vmatpush.msra.mxu2 %v752_v34  ;;  %v287_v63 = vperm.slane %v284_v22, 1 }
  0x8d   : > { %960 = vmatpush.msra.mxu3 %v1793_v14  ;;  %814 = vmatpush.msra.mxu0 %v1837_v56 }
  0x8e   : > { %852 = vmatpush.msra.mxu1 %v1793_v14  ;;  %925 = vmatpush.msra.mxu2 %v758_v12 }
  0x8f   : > { %962 = vmatpush.msra.mxu3 %v1812_v32  ;;  %817 = vmatpush.msra.mxu0 %v1850_v26 }
  0x90   : > { %854 = vmatpush.msra.mxu1 %v1812_v32  ;;  %929 = vmatpush.msra.mxu2 %v764_v4 }
  0x91   : > { %964 = vmatpush.msra.mxu3 %v1825_v8  ;;  %931 = vmatmul.f32.vlgmr.msra.gmra.mxu2 %v1852_v53 }
  0x92   : > { %820 = vmatpush.msra.mxu0 %v1874_v20  ;;  %856 = vmatpush.msra.mxu1 %v1825_v8 }
  0x93   : > { %966 = vmatpush.msra.mxu3 %v1847_v16  ;;  %823 = vmatmul.f32.vlgmr.msra.gmra.mxu0 %v1871_v19 }
  0x94   : > { %968 = vmatmul.f32.vlgmr.msra.gmra.mxu3 %v1852_v53  ;;  %858 = vmatpush.msra.mxu1 %v1847_v16 }
  0x95   : > { %862 = vmatmul.f32.vlgmr.msra.gmra.mxu1 %v1892_v15 }
  0xdf   : > { %v483_v36 = vpop.f32.mrf.mxu2 }
  0xed   : > { %v328_v31 = vpop.f32.mrf.mxu0 }
  0xee   : > { %v329_v51 = vadd.f32 %v328_v31, %v286_v23 }
  0xef   : > { %v429_v54 = vpop.f32.mrf.mxu1 }
  0xf0   : > { %v430_v60 = vadd.f32 %v429_v54, %v329_v51 }
  0xf1   : > { %v522_v59 = vpop.f32.mrf.mxu3 }
  0xf2   : > { %v484_v1 = vadd.f32 %v483_v36, %v430_v60 }
  0xf4   : > { %v523_v38 = vadd.f32 %v522_v59, %v484_v1 }
  0xf6   : > { %v591_v48 = vpop.f32.mrf.mxu0 }
  0xf7   : > { %v592_v6 = vadd.f32 %v591_v48, %v523_v38 }
  0xf9   : > { %v628_v25 = vpop.f32.mrf.mxu1 }
  0xfa   : > { %v629_v0 = vadd.f32 %v628_v25, %v592_v6 }
  0xfc   : > { %972 = vst [vmem:[%s247_s23] sm:$0xff] %v629_v0 }
 0x10b   : > { %v669_v14 = vpop.f32.mrf.mxu2 }
 0x10c   : > { %v670_v13 = vadd.f32 %v669_v14, %v287_v63 }
 0x10e   : > { %v770_v50 = vpop.f32.mrf.mxu3 }
 0x10f   : > { %v771_v41 = vadd.f32 %v770_v50, %v670_v13 }
 0x110   : > { %v824_v32 = vpop.f32.mrf.mxu0 }
 0x111   : > { %v825_v18 = vadd.f32 %v824_v32, %v771_v41 }
 0x112   : > { %v863_v28 = vpop.f32.mrf.mxu1 }
 0x113   : > { %v864_v8 = vadd.f32 %v863_v28, %v825_v18 }
 0x114   : > { %v932_v55 = vpop.f32.mrf.mxu2 }
 0x115   : > { %v933_v56 = vadd.f32 %v932_v55, %v864_v8 }
 0x117   : > { %v969_v21 = vpop.f32.mrf.mxu3 }
 0x118   : > { %v970_v16 = vadd.f32 %v969_v21, %v933_v56 }
 0x11a   : > { %973 = vst [vmem:[%s247_s23 + $0x8] sm:$0xff] %v970_v16 }
 0x11b   : > { %1318 = shalt.err (!%p1315_p13)
}
 0x11c   : > { %1126 = dma.vmem_to_hbm [thread:$0]  (%p1477_p0), %s991_s25, 256, %s993_s26, %s975_s27  }
 0x11d PF: > { %s1004_s5 = sand.u32 1, %s1357_s12   ;;  %p1140_p2 = pnand %p1102_p6, %p1484_p5 }
 0x11e   : > { %s1005_s9 = scalar_lea.sflag [#allocation4], %s1004_s5 }
 0x11f   : > { %p1141_p4 = pneg %p1140_p2 }
 0x121   : > { %1352 = dma.done.wait (%p1141_p4), %s1005_s9, 256  }
 0x122   : > { %1354 = vsyncadd (%p1141_p4), %s1005_s9, 4294967040  ;;  %s20_s17 = sadd.s32 1, %s1377_s17   ;;  %s2130_s12 = smov %s1361_s13 }
 0x123   : > { %p17_p7 = scmp.ge.s32.totalorder %s20_s17, 4   ;;  %s2131_s13 = smov %s1365_s14 }
 0x124   : > { %s2132_s14 = smov %s1482_s20  ;;  %s2133_s15 = smov %s1373_s16 }
 0x125   : > { %s2134_s16 = smov %s2136_s6  ;;  %19 = sbr.rel (!%p17_p7) target bundleno = 7 (0x7), region = 87 }
 0x12a   :  { %1011 = vsyncpa [#allocation3], 1 }
 0x12b   :  { %1013 = vsyncpa [#allocation3 + $0x1], 1 }
 0x12c   :  { %1014 = vsyncpa [#allocation6], 1 }
 0x12d   :  { %1015 = vsyncpa [#allocation4], 1 }
 0x12e   :  { %1017 = vsyncpa [#allocation4 + $0x1], 1 }

</bundles_post_ra>
